<compile_context>
chip_gen: v7x
topology: tpu7x:2x2x1
jax: 0.10.0
libtpu: 0.0.40
codegen_flags: <defaults>
</compile_context>

<pallas_src>
import jax
import jax.numpy as jnp
from jax.experimental import pallas as pl
from jax.experimental.pallas import tpu as pltpu

STATE_DIM = 9
HIDDEN = 64
ACTION_DIM = 4


def _round_up(x, m):
    return ((x + m - 1) // m) * m


def dqn_mlp_kernel(x_ref, w1_ref, b1_ref, w2_ref, b2_ref, w3_ref, b3_ref, o_ref):
    """Fused 3-layer MLP on one batch tile: tanh(relu(relu(x@W1+b1)@W2+b2)@W3+b3)."""
    x = x_ref[...]

    # Layer 1: Linear(state_dim -> 64) + ReLU
    h1 = jnp.dot(x, w1_ref[...], preferred_element_type=jnp.float32) + b1_ref[...]
    h1 = jnp.maximum(h1, 0.0)

    # Layer 2: Linear(64 -> 64) + ReLU (no K-padding; hidden stays 64 lanes)
    h2 = jnp.dot(h1.astype(w2_ref.dtype), w2_ref[...],
                 preferred_element_type=jnp.float32) + b2_ref[...]
    h2 = jnp.maximum(h2, 0.0)

    # Layer 3: Linear(64 -> action_dim) + tanh on the real action lanes only.
    out = jnp.dot(h2.astype(w3_ref.dtype), w3_ref[...],
                  preferred_element_type=jnp.float32) + b3_ref[...]
    o_ref[...] = jnp.tanh(out).astype(o_ref.dtype)


def dqn_forward(x, params, *, tile_b=1024, matmul_dtype=None):
    """x: [B, state_dim] float32. Returns [B, action_dim] float32 in [-1, 1].

    matmul_dtype: set to jnp.bfloat16 to feed the bf16-native MXU (worthwhile on
    v5e as well as v6e/v7x); bias add / ReLU / tanh remain f32.  Default keeps
    f32 operands everywhere (bit-matches the f32 reference to ~1e-5).
    """
    w1, b1, w2, b2, w3, b3 = (params["w1"], params["b1"], params["w2"],
                              params["b2"], params["w3"], params["b3"])
    B, state_dim = x.shape
    hidden = w1.shape[1]
    action_dim = w3.shape[1]

    if matmul_dtype is not None:
        x = x.astype(matmul_dtype)
        w1, w2, w3 = (w.astype(matmul_dtype) for w in (w1, w2, w3))

    # Batch tiling: no host-side padding.  grid = cdiv(B, tile_b); Pallas handles
    # the ragged last block (input rows past B are stale VMEM, their outputs are
    # never written back).  tile_b is clamped for tiny batches, kept a multiple
    # of 8 for sublane alignment.
    tile_b = max(8, min(tile_b, _round_up(B, 8)))
    grid = (pl.cdiv(B, tile_b),)

    def batch_spec(cols):
        return pl.BlockSpec((tile_b, cols), lambda i: (i, 0))

    def pinned_spec(shape):
        # Same block index every grid step -> DMA'd once, stays resident in VMEM.
        return pl.BlockSpec(shape, lambda i: (0, 0))

    # Real (unpadded) traffic / work for the scheduler hint.
    flops = 2 * B * (state_dim * hidden + hidden * hidden + hidden * action_dim)
    bytes_accessed = (
        x.size * x.dtype.itemsize
        + sum(a.size * a.dtype.itemsize for a in (w1, b1, w2, b2, w3, b3))
        + B * action_dim * 4
    )

    out = pl.pallas_call(
        dqn_mlp_kernel,
        out_shape=jax.ShapeDtypeStruct((B, action_dim), jnp.float32),
        grid=grid,
        in_specs=[
            batch_spec(state_dim),
            pinned_spec(w1.shape),
            pinned_spec(b1.shape),
            pinned_spec(w2.shape),
            pinned_spec(b2.shape),
            pinned_spec(w3.shape),
            pinned_spec(b3.shape),
        ],
        out_specs=pl.BlockSpec((tile_b, action_dim), lambda i: (i, 0)),
        compiler_params=pltpu.CompilerParams(
            dimension_semantics=("parallel",),
        ),
        cost_estimate=pl.CostEstimate(
            flops=flops,
            transcendentals=B * action_dim,
            bytes_accessed=bytes_accessed,
        ),
    )(x, w1, b1, w2, b2, w3, b3)

    return out


def init_params(key, state_dim=STATE_DIM, action_dim=ACTION_DIM, hidden=HIDDEN):
    """PyTorch nn.Linear default init (uniform +-1/sqrt(fan_in)), natural shapes,
    weights stored as [in, out] (i.e. already transposed vs torch)."""
    ks = jax.random.split(key, 6)

    def lin(kw, kb, fan_in, fan_out):
        bound = 1.0 / jnp.sqrt(float(fan_in))
        w = jax.random.uniform(kw, (fan_in, fan_out), jnp.float32, -bound, bound)
        b = jax.random.uniform(kb, (1, fan_out), jnp.float32, -bound, bound)
        return w, b

    w1, b1 = lin(ks[0], ks[1], state_dim, hidden)
    w2, b2 = lin(ks[2], ks[3], hidden, hidden)
    w3, b3 = lin(ks[4], ks[5], hidden, action_dim)
    return {"w1": w1, "b1": b1, "w2": w2, "b2": b2, "w3": w3, "b3": b3}


def _ref(x, p):
    h = jnp.maximum(x @ p["w1"] + p["b1"], 0.0)
    h = jnp.maximum(h @ p["w2"] + p["b2"], 0.0)
    return jnp.tanh(h @ p["w3"] + p["b3"])


if __name__ == "__main__":
    key = jax.random.PRNGKey(0)
    k_params, k_x, k_x2 = jax.random.split(key, 3)

    params = init_params(k_params)

    # Small batch (single tile, block exactly covers the array).
    x = jax.random.normal(k_x, (8, STATE_DIM), jnp.float32)
    out = jax.block_until_ready(dqn_forward(x, params))
    assert out.shape == (8, ACTION_DIM)
    assert bool(jnp.all(jnp.abs(out) <= 1.0))
    assert bool(jnp.allclose(out, _ref(x, params), atol=1e-5))

    # Larger ragged batch with a small tile to exercise the multi-step grid,
    # pinned-weight reuse, and the masked (ragged) last block: 1000 / 256 -> 4 steps.
    x2 = jax.random.normal(k_x2, (1000, STATE_DIM), jnp.float32)
    out2 = jax.block_until_ready(dqn_forward(x2, params, tile_b=256))
    assert out2.shape == (1000, ACTION_DIM)
    assert bool(jnp.allclose(out2, _ref(x2, params), atol=1e-5))

    print("KERNEL_OK")
</pallas_src>

<mosaic_0001>
module attributes {stable_mosaic.version = 11 : i64} {
  func.func @dqn_mlp_kernel(%arg0: i32, %arg1: memref<8x9xf32, #tpu.memory_space<vmem>>, %arg2: memref<9x64xf32, #tpu.memory_space<vmem>>, %arg3: memref<1x64xf32, #tpu.memory_space<vmem>>, %arg4: memref<64x64xf32, #tpu.memory_space<vmem>>, %arg5: memref<1x64xf32, #tpu.memory_space<vmem>>, %arg6: memref<64x4xf32, #tpu.memory_space<vmem>>, %arg7: memref<1x4xf32, #tpu.memory_space<vmem>>, %arg8: memref<8x4xf32, #tpu.memory_space<vmem>>) attributes {dimension_semantics = [#tpu.dimension_semantics<parallel>], iteration_bounds = array<i64: 1>, scalar_prefetch = 0 : i64, scratch_operands = 0 : i64, tpu.core_type = #tpu.core_type<tc>, window_params = [{transform_indices = @transform_0, window_bounds = array<i64: 8, 9>}, {pipeline_mode = #tpu.pipeline_mode<synchronous>, transform_indices = @transform_1, window_bounds = array<i64: 9, 64>}, {pipeline_mode = #tpu.pipeline_mode<synchronous>, transform_indices = @transform_2, window_bounds = array<i64: 1, 64>}, {pipeline_mode = #tpu.pipeline_mode<synchronous>, transform_indices = @transform_3, window_bounds = array<i64: 64, 64>}, {pipeline_mode = #tpu.pipeline_mode<synchronous>, transform_indices = @transform_4, window_bounds = array<i64: 1, 64>}, {pipeline_mode = #tpu.pipeline_mode<synchronous>, transform_indices = @transform_5, window_bounds = array<i64: 64, 4>}, {pipeline_mode = #tpu.pipeline_mode<synchronous>, transform_indices = @transform_6, window_bounds = array<i64: 1, 4>}, {transform_indices = @transform_7, window_bounds = array<i64: 8, 4>}]} {
    %c0 = arith.constant 0 : index
    %c0_0 = arith.constant 0 : index
    %0 = vector.load %arg1[%c0, %c0_0] : memref<8x9xf32, #tpu.memory_space<vmem>>, vector<8x9xf32>
    %c0_1 = arith.constant 0 : index
    %c0_2 = arith.constant 0 : index
    %1 = vector.load %arg2[%c0_1, %c0_2] : memref<9x64xf32, #tpu.memory_space<vmem>>, vector<9x64xf32>
    %cst = arith.constant dense<0.000000e+00> : vector<8x64xf32>
    %2 = tpu.matmul %0, %1, %cst {dimension_numbers = #tpu.dot_dimension_numbers<[1], [0], [0], [1], [0, 0, 1, 1], [], []>} : vector<8x9xf32>, vector<9x64xf32>, vector<8x64xf32> -> vector<8x64xf32>
    %c0_3 = arith.constant 0 : index
    %c0_4 = arith.constant 0 : index
    %3 = vector.load %arg3[%c0_3, %c0_4] : memref<1x64xf32, #tpu.memory_space<vmem>>, vector<1x64xf32>
    %4 = vector.broadcast %3 : vector<1x64xf32> to vector<8x64xf32>
    %5 = arith.addf %2, %4 : vector<8x64xf32>
    %cst_5 = arith.constant 0.000000e+00 : f32
    %6 = vector.broadcast %cst_5 : f32 to vector<8x64xf32>
    %7 = arith.maximumf %5, %6 : vector<8x64xf32>
    %c0_6 = arith.constant 0 : index
    %c0_7 = arith.constant 0 : index
    %8 = vector.load %arg4[%c0_6, %c0_7] : memref<64x64xf32, #tpu.memory_space<vmem>>, vector<64x64xf32>
    %cst_8 = arith.constant dense<0.000000e+00> : vector<8x64xf32>
    %9 = tpu.matmul %7, %8, %cst_8 {dimension_numbers = #tpu.dot_dimension_numbers<[1], [0], [0], [1], [0, 0, 1, 1], [], []>} : vector<8x64xf32>, vector<64x64xf32>, vector<8x64xf32> -> vector<8x64xf32>
    %c0_9 = arith.constant 0 : index
    %c0_10 = arith.constant 0 : index
    %10 = vector.load %arg5[%c0_9, %c0_10] : memref<1x64xf32, #tpu.memory_space<vmem>>, vector<1x64xf32>
    %11 = vector.broadcast %10 : vector<1x64xf32> to vector<8x64xf32>
    %12 = arith.addf %9, %11 : vector<8x64xf32>
    %cst_11 = arith.constant 0.000000e+00 : f32
    %13 = vector.broadcast %cst_11 : f32 to vector<8x64xf32>
    %14 = arith.maximumf %12, %13 : vector<8x64xf32>
    %c0_12 = arith.constant 0 : index
    %c0_13 = arith.constant 0 : index
    %15 = vector.load %arg6[%c0_12, %c0_13] : memref<64x4xf32, #tpu.memory_space<vmem>>, vector<64x4xf32>
    %cst_14 = arith.constant dense<0.000000e+00> : vector<8x4xf32>
    %16 = tpu.matmul %14, %15, %cst_14 {dimension_numbers = #tpu.dot_dimension_numbers<[1], [0], [0], [1], [0, 0, 1, 1], [], []>} : vector<8x64xf32>, vector<64x4xf32>, vector<8x4xf32> -> vector<8x4xf32>
    %c0_15 = arith.constant 0 : index
    %c0_16 = arith.constant 0 : index
    %17 = vector.load %arg7[%c0_15, %c0_16] : memref<1x4xf32, #tpu.memory_space<vmem>>, vector<1x4xf32>
    %18 = vector.broadcast %17 : vector<1x4xf32> to vector<8x4xf32>
    %19 = arith.addf %16, %18 : vector<8x4xf32>
    %20 = math.tanh %19 : vector<8x4xf32>
    %c0_17 = arith.constant 0 : index
    %c0_18 = arith.constant 0 : index
    %21 = vector.load %arg8[%c0_17, %c0_18] : memref<8x4xf32, #tpu.memory_space<vmem>>, vector<8x4xf32>
    tpu.vector_store %arg8[%c0_17, %c0_18], %20 {strides = array<i32>} : memref<8x4xf32, #tpu.memory_space<vmem>>, vector<8x4xf32>,
    return
  }
  func.func @transform_0(%arg0: i32) -> (i32, i32) {
    %c0_i32 = arith.constant 0 : i32
    %c0_i32_0 = arith.constant 0 : i32
    return %arg0, %c0_i32 : i32, i32
  }
  func.func @transform_1(%arg0: i32) -> (i32, i32) {
    %c0_i32 = arith.constant 0 : i32
    %c0_i32_0 = arith.constant 0 : i32
    %c0_i32_1 = arith.constant 0 : i32
    return %c0_i32, %c0_i32_0 : i32, i32
  }
  func.func @transform_2(%arg0: i32) -> (i32, i32) {
    %c0_i32 = arith.constant 0 : i32
    %c0_i32_0 = arith.constant 0 : i32
    %c0_i32_1 = arith.constant 0 : i32
    return %c0_i32, %c0_i32_0 : i32, i32
  }
  func.func @transform_3(%arg0: i32) -> (i32, i32) {
    %c0_i32 = arith.constant 0 : i32
    %c0_i32_0 = arith.constant 0 : i32
    %c0_i32_1 = arith.constant 0 : i32
    return %c0_i32, %c0_i32_0 : i32, i32
  }
  func.func @transform_4(%arg0: i32) -> (i32, i32) {
    %c0_i32 = arith.constant 0 : i32
    %c0_i32_0 = arith.constant 0 : i32
    %c0_i32_1 = arith.constant 0 : i32
    return %c0_i32, %c0_i32_0 : i32, i32
  }
  func.func @transform_5(%arg0: i32) -> (i32, i32) {
    %c0_i32 = arith.constant 0 : i32
    %c0_i32_0 = arith.constant 0 : i32
    %c0_i32_1 = arith.constant 0 : i32
    return %c0_i32, %c0_i32_0 : i32, i32
  }
  func.func @transform_6(%arg0: i32) -> (i32, i32) {
    %c0_i32 = arith.constant 0 : i32
    %c0_i32_0 = arith.constant 0 : i32
    %c0_i32_1 = arith.constant 0 : i32
    return %c0_i32, %c0_i32_0 : i32, i32
  }
  func.func @transform_7(%arg0: i32) -> (i32, i32) {
    %c0_i32 = arith.constant 0 : i32
    %c0_i32_0 = arith.constant 0 : i32
    return %arg0, %c0_i32 : i32, i32
  }
}

</mosaic_0001>

<bundles_post_ra>
// kernel: tpu_custom_call.1
= control target key start
LH: loop header
LB: loop body
LE: loop exit
PB: predicated region body
PF: predicated region fallthrough
CT: control target
= control target key end

     0   :  { %12 = vsyncpa [#allocation3], 0  ;;  %s449_s24 = smov [#allocation2]   ;;  %s574_s0 = inlined_call_operand.vmem [shape: f32[8,9], index: 0, kind: input, shape index: {}]   ;;  %s575_s1 = inlined_call_operand.hbm [shape: f32[9,64], index: 1, kind: input, shape index: {}]   ;;  %s576_s2 = inlined_call_operand.vmem [shape: f32[1,64], index: 2, kind: input, shape index: {}]   ;;  %s577_s3 = inlined_call_operand.vmem [shape: f32[64,64], index: 3, kind: input, shape index: {}]   ;;  %s578_s4 = inlined_call_operand.vmem [shape: f32[1,64], index: 4, kind: input, shape index: {}]   ;;  %s579_s5 = inlined_call_operand.vmem [shape: f32[64,4], index: 5, kind: input, shape index: {}]   ;;  %s580_s6 = inlined_call_operand.vmem [shape: f32[1,4], index: 6, kind: input, shape index: {}]   ;;  %s581_s7 = inlined_call_operand.vmem [shape: f32[8,4], index: 7, kind: output, shape index: {}]  }
   0x1   :  { %s20_s25 = sshll.u32 %s449_s24, 4  ;;  %s425_s28 = scalar_lea.hbm %s575_s1, 256  ;;  %s21_s25 = int_to_ptr.vmem [resolvable:$true] %s20_s25 }
   0x2   :  { %p426_p0 = scmp.ne.s32.totalorder %s575_s1, %s425_s28  ;;  %p429_p1 = scmp.lt.u32.totalorder %s425_s28, %s575_s1 }
   0x4   :  { %p431_p2 = pnand %p429_p1, %p426_p0 }
   0x6   :  { %434 = shalt.err (!%p431_p2)
}
   0x7   :  { %s435_s10 = scalar_lea.vmem %s21_s25, 256  ;;  %p440_p4 = scmp.lt.s32.totalorder %s21_s25, %s21_s25 }
   0x8   :  { %p436_p3 = scmp.ne.s32.totalorder %s21_s25, %s435_s10  ;;  %p441_p5 = scmp.lt.s32.totalorder %s435_s10, %s435_s10 }
   0xa   :  { %p442_p6 = por %p441_p5, %p440_p4 }
   0xc   :  { %p443_p7 = pnand %p442_p6, %p436_p3 }
   0xe   :  { %446 = shalt.err (!%p443_p7)
}
   0xf   :  { %s450_s11 = smov 128   ;;  %s451_s12 = smov 8  }
  0x10   :  { %26 = dma.hbm_to_vmem [thread:$0]  %s575_s1, 256, %s21_s25, [#allocation3], %s450_s11, %s450_s11, %s451_s12  }
  0x11   :  { %447 = dma.done.wait [#allocation3], 256  }
  0x12   :  { %448 = vsyncadd [#allocation3], 4294967040  ;;  %v452_v0 = vmov 0.0|0.0   ;;  %vm453_vm0 = vmmov 0   ;;  %v454_v1 = vmov 0.0   ;;  %vm54_vm1 = vcmask 1040384  }
  0x13   :  { %388 = vmatprep.subr.bf16.mxu0 %v452_v0  ;;  %392 = vmatprep.subr.bf16.mxu1 %v452_v0  ;;  %v41_v2 = vld [vmem:[#allocation2] sm:$0xff]  ;;  %v42_v3 = vld [vmem:[#allocation2 + $0x8] sm:$0x1]  ;;  %vm455_vm2 = vmmov 1   ;;  %v131_v7 = vld [vmem:[%s577_s3 + $0x10] sm:$0xff]  ;;  %vm50_vm4 = vcmask 72704  }
  0x14   :  { %347 = vmatprep.mubr.msk.f32.mxu0 %vm453_vm0, %v454_v1  ;;  %366 = vmatprep.mubr.msk.f32.mxu1 %vm453_vm0, %v454_v1  ;;  %vm390_vm3 = vmpackc.low %vm54_vm1, %vm455_vm2  ;;  %v389_v4 = vpack.c.bf16 %v42_v3, %v41_v2  ;;  %v129_v5 = vld [vmem:[%s577_s3] sm:$0xff]  ;;  %v130_v6 = vld [vmem:[%s577_s3 + $0x8] sm:$0xff]  ;;  %vm144_vm5 = vcmask 523264   ;;  %vm308_vm6 = vcmask 31744  }
  0x15   :  { %v393_v8 = vpack.c.bf16 %v130_v6, %v129_v5  ;;  %v132_v9 = vld [vmem:[%s577_s3 + $0x18] sm:$0xff]  ;;  %v40_v10 = vld [vmem:[%s574_s0] sm:$0xff]  ;;  %v134_v13 = vld [vmem:[%s577_s3 + $0x28] sm:$0xff] }
  0x16   :  { %391 = vmatpush3.bf16.msk.msra.mxu0 %vm390_vm3, %v389_v4  ;;  %v396_v11 = vpack.c.bf16 %v132_v9, %v131_v7  ;;  %v133_v12 = vld [vmem:[%s577_s3 + $0x20] sm:$0xff]  ;;  %v135_v15 = vld [vmem:[%s577_s3 + $0x30] sm:$0xff]  ;;  %v136_v16 = vld [vmem:[%s577_s3 + $0x38] sm:$0xff] }
  0x17   :  { %394 = vmatpush3.bf16.msra.mxu1 %v393_v8  ;;  %404 = vmatprep.subr.bf16.mxu0 %v452_v0  ;;  %v399_v14 = vpack.c.bf16 %v134_v13, %v133_v12  ;;  %v402_v17 = vpack.c.bf16 %v136_v16, %v135_v15  ;;  %v219_v18 = vld [vmem:[%s579_s5] sm:$0xff]  ;;  %v220_v19 = vld [vmem:[%s579_s5 + $0x8] sm:$0xff]  ;;  %v221_v20 = vld [vmem:[%s579_s5 + $0x10] sm:$0xff] }
  0x18   :  { %395 = vmatprep.subr.bf16.mxu1 %v452_v0  ;;  %v405_v21 = vpack.c.bf16 %v220_v19, %v219_v18  ;;  %v222_v22 = vld [vmem:[%s579_s5 + $0x18] sm:$0xff]  ;;  %v223_v24 = vld [vmem:[%s579_s5 + $0x20] sm:$0xff]  ;;  %v224_v25 = vld [vmem:[%s579_s5 + $0x28] sm:$0xff] }
  0x19   :  { %348 = vmatmul.mubr.msk.f32.vlgmr.msra.gmra.mrb[0].mxu0 %vm50_vm4, %v40_v10  ;;  %v408_v23 = vpack.c.bf16 %v222_v22, %v221_v20  ;;  %v411_v26 = vpack.c.bf16 %v224_v25, %v223_v24  ;;  %v315_v27 = vld [vmem:[%s576_s2] ss:$0 sm:$0xff]  ;;  %v225_v32 = vld [vmem:[%s579_s5 + $0x30] sm:$0xff]  ;;  %v226_v33 = vld [vmem:[%s579_s5 + $0x38] sm:$0xff] }
  0x1a   :  { %385 = vmatprep.mubr.msk.f32.mxu0 %vm453_vm0, %v454_v1  ;;  %406 = vmatpush3.bf16.msra.mxu0 %v405_v21  ;;  %v414_v34 = vpack.c.bf16 %v226_v33, %v225_v32  ;;  %v318_v35 = vld [vmem:[%s578_s4] ss:$0 sm:$0xff] }
  0x1b   :  { %397 = vmatpush3.bf16.msra.mxu1 %v396_v11  ;;  %407 = vmatprep.subr.bf16.mxu0 %v452_v0  ;;  %v320_v40 = vld [vmem:[%s580_s6] ss:$0 sm:$0xff] }
  0x1c   :  { %398 = vmatprep.subr.bf16.mxu1 %v452_v0 }
  0x1e   :  { %409 = vmatpush3.bf16.msra.mxu0 %v408_v23 }
  0x1f   :  { %400 = vmatpush3.bf16.msra.mxu1 %v399_v14  ;;  %410 = vmatprep.subr.bf16.mxu0 %v452_v0 }
  0x20   :  { %401 = vmatprep.subr.bf16.mxu1 %v452_v0 }
  0x22   :  { %412 = vmatpush3.bf16.msra.mxu0 %v411_v26 }
  0x23   :  { %403 = vmatpush3.bf16.msra.mxu1 %v402_v17  ;;  %413 = vmatprep.subr.bf16.mxu0 %v452_v0 }
  0x26   :  { %415 = vmatpush3.bf16.msra.mxu0 %v414_v34 }
  0xec   :  { %v124_v28 = vpop.f32.mrb[0].mxu0 }
  0xed   :  { %v125_v29 = vadd.f32 %v315_v27, %v124_v28  ;;  %v349_v30 = vpop.f32.mrb[1].mxu0 }
  0xef   :  { %v128_v31 = vmax.f32 %v125_v29, 0.0 }
  0xf1   :  { %367 = vmatmul.mubr.msk.f32.vlgmr.msra.gmra.mrb[0].mxu1 %vm144_vm5, %v128_v31 }
 0x1c4   :  { %v214_v36 = vpop.f32.mrb[0].mxu1 }
 0x1c5   :  { %v215_v37 = vadd.f32 %v318_v35, %v214_v36  ;;  %v368_v38 = vpop.f32.mrb[1].mxu1 }
 0x1c7   :  { %v218_v39 = vmax.f32 %v215_v37, 0.0 }
 0x1c9   :  { %386 = vmatmul.mubr.msk.f32.vlgmr.msra.gmra.mrb[2].mxu0 %vm144_vm5, %v218_v39 }
 0x29c   :  { %v303_v41 = vpop.f32.mrb[2].mxu0 }
 0x29d   :  { %v304_v42 = vadd.f32 %v320_v40, %v303_v41  ;;  %v387_v43 = vpop.f32.mrb[3].mxu0 }
 0x29f   :  { %423 = vtanh.f32 %v304_v42 }
 0x2a9   :  { %v424_v44 = vpop.eup %423 }
 0x2aa   :  { %309 = vst.msk [vmem:[%s581_s7] sm:$0xff] %vm308_vm6, %v424_v44 }
 0x2ab   :  { %314 = vsyncpa [#allocation3], 1 }

</bundles_post_ra>
